<compile_context>
chip_gen: v7x
topology: tpu7x:2x2x1
jax: 0.10.0
libtpu: 0.0.40
codegen_flags: <defaults>
</compile_context>

<pallas_src>
import functools

import jax
import jax.numpy as jnp
from jax.experimental import pallas as pl
from jax.experimental.pallas import tpu as pltpu


def _stable_sigmoid(x):
    # 1/(1+exp(-x)) without inf intermediates for large |x|.
    z = jnp.exp(-jnp.abs(x))
    return jnp.where(x >= 0, 1.0 / (1.0 + z), z / (1.0 + z))


def _vmem_capacity_bytes():
    # Generation-aware VMEM capacity (v7x: 64 MiB, v5e/v6e: 128 MiB); fall back
    # to the most constrained generation if the query is unavailable.
    try:
        cap = getattr(pltpu.get_tpu_info(), "vmem_capacity_bytes", None)
        if cap:
            return int(cap)
    except Exception:
        pass
    return 64 << 20


# ---------------------------------------------------------------------------
# Fused ChannelAttention kernel: one grid step handles a chunk of `bb` batches.
#   x*_ref : (bb, C, HW)   lane-dense feature maps (HW multiple of 128)
#   w1_ref : (Cr, C)       fc1.weight with eval-mode BN scale folded in (f32)
#   b1_ref : (Cr, 1)       folded BN bias (f32)
#   w2_ref : (C, Cr)       fc2.weight (f32)
#   o1/o2  : (bb, C, HW)   alpha*x1, (1-alpha)*x2
# ---------------------------------------------------------------------------
def channel_attention_kernel(x1_ref, x2_ref, w1_ref, b1_ref, w2_ref,
                             o1_ref, o2_ref, *, bb, inv_hw):
    w1 = w1_ref[...]                     # (Cr, C)  f32
    b1 = b1_ref[...]                     # (Cr, 1)  f32
    w2 = w2_ref[...]                     # (C, Cr)  f32

    # --- Global average pool of (x1 + x2), f32 accumulation.  The x1+x2 slab
    # is never materialized: two in-layout (keepdims) lane reductions per
    # batch, assembled into a (C, bb) column matrix (lane concat only when
    # bb > 1).  Columns are already sublane-major, so no relayouts occur.
    cols = []
    for b in range(bb):                  # static unroll, bb is small
        cols.append(
            jnp.sum(x1_ref[b].astype(jnp.float32), axis=-1, keepdims=True)
            + jnp.sum(x2_ref[b].astype(jnp.float32), axis=-1, keepdims=True))
    pooled = cols[0] if bb == 1 else jnp.concatenate(cols, axis=-1)
    pooled = pooled * inv_hw                                           # (C, bb)

    # --- fc1 (BN scale pre-folded) + bias + ReLU, then fc2 + sigmoid.
    # One batched MXU pass per FC for the whole chunk (not 2*bb tiny dots).
    h = jnp.dot(w1, pooled, preferred_element_type=jnp.float32)        # (Cr, bb)
    h = jnp.maximum(h + b1, 0.0)
    alpha = _stable_sigmoid(
        jnp.dot(w2, h, preferred_element_type=jnp.float32))            # (C, bb)

    # --- Apply the per-channel gate.  Column b of alpha is a (C, 1) sublane
    # column -> broadcasts over the HW lanes of (C, HW) with no relayout.
    # Elementwise math stays in the input dtype (bf16-native on v6e/v7x);
    # the static unroll below contains only VALU work.
    for b in range(bb):
        a_b = alpha[:, b:b + 1]                                        # (C, 1) f32
        x1b = x1_ref[b]
        x2b = x2_ref[b]
        o1_ref[b] = (a_b.astype(x1b.dtype) * x1b).astype(o1_ref.dtype)
        o2_ref[b] = ((1.0 - a_b).astype(x2b.dtype) * x2b).astype(o2_ref.dtype)


def channel_attention(x1, x2, P):
    assert x1.shape == x2.shape and x1.dtype == x2.dtype
    B, C, H, W = x1.shape
    HW = H * W
    Cr = P["w1"].shape[0]

    # Free reshape (row-major NCHW == (B, C, H*W)): trailing dim lane-dense.
    x1f = x1.reshape(B, C, HW)
    x2f = x2.reshape(B, C, HW)

    # Fold the eval-mode BatchNorm1d scale into fc1; pre-cast params to f32.
    w1 = (P["s1"].reshape(Cr, 1) * P["w1"]).astype(jnp.float32)        # (Cr, C)
    b1 = P["b1"].reshape(Cr, 1).astype(jnp.float32)                    # (Cr, 1)
    w2 = P["w2"].astype(jnp.float32)                                   # (C, Cr)

    # ---- Batch-chunk (bb) selection ---------------------------------------
    # Constraints (perf review):
    #   * grid must have >= min(B, 4) steps so the pipeline overlaps DMA with
    #     compute and the "parallel" axis shards across TensorCores,
    #   * prefer an even step count (v7x has 2 TCs per chip),
    #   * the per-step working set must fit a generation-aware VMEM budget.
    vmem_cap = _vmem_capacity_bytes()
    budget = vmem_cap * 35 // 100
    # 4 feature slabs (x1, x2, o1, o2) x 2 pipeline buffers + f32 pooling
    # temporaries per chunk-batch.
    per_batch_bytes = C * HW * (8 * x1.dtype.itemsize + 8)
    min_steps = min(B, 4)
    candidates = [c for c in range(1, B + 1)
                  if B % c == 0 and B // c >= min_steps]
    fitting = [c for c in candidates if c == 1 or c * per_batch_bytes <= budget]
    even = [c for c in fitting if (B // c) % 2 == 0]
    bb = max(even) if even else max(fitting)
    grid = (B // bb,)

    # ---- BlockSpecs --------------------------------------------------------
    feat_block_bytes = bb * C * HW * x1.dtype.itemsize
    if grid[0] >= 3 and feat_block_bytes < (512 << 10):
        # Tiny blocks + deep grid: deeper buffering hides DMA issue latency.
        feat_in_spec = pl.BlockSpec((bb, C, HW), lambda i: (i, 0, 0),
                                    pipeline_mode=pl.Buffered(3))
    else:
        feat_in_spec = pl.BlockSpec((bb, C, HW), lambda i: (i, 0, 0))
    feat_out_spec = pl.BlockSpec((bb, C, HW), lambda i: (i, 0, 0))
    param_specs = [pl.BlockSpec(p.shape, lambda i: (0, 0))
                   for p in (w1, b1, w2)]

    kernel = functools.partial(channel_attention_kernel, bb=bb, inv_hw=1.0 / HW)
    itemsize = x1.dtype.itemsize
    cost = pl.CostEstimate(
        flops=6 * B * C * HW + 4 * B * C * Cr,
        transcendentals=B * C,
        bytes_accessed=4 * B * C * HW * itemsize
        + (w1.size + b1.size + w2.size) * 4,
    )

    o1, o2 = pl.pallas_call(
        kernel,
        out_shape=(jax.ShapeDtypeStruct((B, C, HW), x1.dtype),
                   jax.ShapeDtypeStruct((B, C, HW), x2.dtype)),
        grid_spec=pltpu.PrefetchScalarGridSpec(
            num_scalar_prefetch=0,
            grid=grid,
            in_specs=[feat_in_spec, feat_in_spec] + param_specs,
            out_specs=[feat_out_spec, feat_out_spec],
        ),
        compiler_params=pltpu.CompilerParams(
            dimension_semantics=("parallel",),
            vmem_limit_bytes=int(vmem_cap * 3 // 4),
        ),
        cost_estimate=cost,
    )(x1f, x2f, w1, b1, w2)
    return o1.reshape(B, C, H, W), o2.reshape(B, C, H, W)


# ---------------------------------------------------------------------------
# Parameters (torch layout) with eval-mode BatchNorm1d folded to scale/bias.
# ---------------------------------------------------------------------------
def _bn1d_fold(key, c, eps=1e-5):
    k1, k2, k3, k4 = jax.random.split(key, 4)
    gamma = 1.0 + 0.1 * jax.random.normal(k1, (c,), jnp.float32)
    beta = 0.1 * jax.random.normal(k2, (c,), jnp.float32)
    rmean = 0.1 * jax.random.normal(k3, (c,), jnp.float32)
    rvar = jnp.abs(1.0 + 0.1 * jax.random.normal(k4, (c,), jnp.float32))
    scale = gamma / jnp.sqrt(rvar + eps)
    bias = beta - rmean * scale
    return scale, bias


def make_params(key, c, r=4):
    cr = c // r
    k1, k2, k3 = jax.random.split(key, 3)
    P = {
        "w1": 0.3 * jax.random.normal(k1, (cr, c), jnp.float32),  # fc1.weight (Cr, C)
        "w2": 0.3 * jax.random.normal(k2, (c, cr), jnp.float32),  # fc2.weight (C, Cr)
    }
    # TODO(synk): BatchNorm1d is evaluated with folded running stats (eval
    # mode); training-mode cross-batch statistics are not expressible in a
    # per-batch-chunk kernel.
    P["s1"], P["b1"] = _bn1d_fold(k3, cr)
    return P


# ---------------------------------------------------------------------------
# Pure-JAX reference (same math, for validation)
# ---------------------------------------------------------------------------
def ref_channel_attention(x1, x2, P):
    x = x1 + x2
    pooled = jnp.mean(x, axis=(2, 3))                        # (B, C)
    h = pooled @ P["w1"].T                                   # (B, Cr)
    h = jnp.maximum(h * P["s1"] + P["b1"], 0.0)
    alpha = jax.nn.sigmoid(h @ P["w2"].T)                    # (B, C)
    alpha = alpha[:, :, None, None]
    return alpha * x1, (1.0 - alpha) * x2


# ---------------------------------------------------------------------------
if __name__ == "__main__":
    B, C, H, W = 2, 16, 16, 16          # ChannelAttention(in_channels=16, r=4)

    key = jax.random.PRNGKey(0)
    k1, k2, kp = jax.random.split(key, 3)
    x1 = jax.random.normal(k1, (B, C, H, W), jnp.float32)    # NCHW, like torch
    x2 = jax.random.normal(k2, (B, C, H, W), jnp.float32)
    P = make_params(kp, C, r=4)

    o1, o2 = jax.block_until_ready(channel_attention(x1, x2, P))
    r1, r2 = jax.block_until_ready(ref_channel_attention(x1, x2, P))

    err = max(float(jnp.max(jnp.abs(o1 - r1))), float(jnp.max(jnp.abs(o2 - r2))))
    ref_max = max(float(jnp.max(jnp.abs(r1))), float(jnp.max(jnp.abs(r2))))
    tol = 1e-4 * (1.0 + ref_max)
    assert o1.shape == (B, C, H, W) and o2.shape == (B, C, H, W)
    assert err < tol, f"max abs err {err} exceeds tol {tol}"
    print("KERNEL_OK")
</pallas_src>

<mosaic_0001>
module attributes {stable_mosaic.version = 11 : i64} {
  func.func @channel_attention_kernel(%arg0: i32, %arg1: memref<1x16x256xf32, #tpu.memory_space<vmem>>, %arg2: memref<1x16x256xf32, #tpu.memory_space<vmem>>, %arg3: memref<4x16xf32, #tpu.memory_space<vmem>>, %arg4: memref<4x1xf32, #tpu.memory_space<vmem>>, %arg5: memref<16x4xf32, #tpu.memory_space<vmem>>, %arg6: memref<1x16x256xf32, #tpu.memory_space<vmem>>, %arg7: memref<1x16x256xf32, #tpu.memory_space<vmem>>) attributes {dimension_semantics = [#tpu.dimension_semantics<parallel>], iteration_bounds = array<i64: 2>, scalar_prefetch = 0 : i64, scratch_operands = 0 : i64, tpu.core_type = #tpu.core_type<tc>, window_params = [{transform_indices = @transform_0, window_bounds = array<i64: 1, 16, 256>}, {transform_indices = @transform_1, window_bounds = array<i64: 1, 16, 256>}, {pipeline_mode = #tpu.pipeline_mode<synchronous>, transform_indices = @transform_2, window_bounds = array<i64: 4, 16>}, {pipeline_mode = #tpu.pipeline_mode<synchronous>, transform_indices = @transform_3, window_bounds = array<i64: 4, 1>}, {pipeline_mode = #tpu.pipeline_mode<synchronous>, transform_indices = @transform_4, window_bounds = array<i64: 16, 4>}, {transform_indices = @transform_5, window_bounds = array<i64: 1, 16, 256>}, {transform_indices = @transform_6, window_bounds = array<i64: 1, 16, 256>}]} {
    %c0 = arith.constant 0 : index
    %c0_0 = arith.constant 0 : index
    %0 = vector.load %arg3[%c0, %c0_0] : memref<4x16xf32, #tpu.memory_space<vmem>>, vector<4x16xf32>
    %c0_1 = arith.constant 0 : index
    %c0_2 = arith.constant 0 : index
    %1 = vector.load %arg4[%c0_1, %c0_2] : memref<4x1xf32, #tpu.memory_space<vmem>>, vector<4x1xf32>
    %c0_3 = arith.constant 0 : index
    %c0_4 = arith.constant 0 : index
    %2 = vector.load %arg5[%c0_3, %c0_4] : memref<16x4xf32, #tpu.memory_space<vmem>>, vector<16x4xf32>
    %c0_5 = arith.constant 0 : index
    %c0_6 = arith.constant 0 : index
    %c0_7 = arith.constant 0 : index
    %3 = vector.load %arg1[%c0_5, %c0_6, %c0_7] : memref<1x16x256xf32, #tpu.memory_space<vmem>>, vector<1x16x256xf32>
    %4 = vector.shape_cast %3 : vector<1x16x256xf32> to vector<16x256xf32>
    %cst = arith.constant dense<0.000000e+00> : vector<16xf32>
    %5 = vector.multi_reduction <add>, %4, %cst [1] : vector<16x256xf32> to vector<16xf32>
    %6 = vector.shape_cast %5 : vector<16xf32> to vector<16x1xf32>
    %c0_8 = arith.constant 0 : index
    %c0_9 = arith.constant 0 : index
    %c0_10 = arith.constant 0 : index
    %7 = vector.load %arg2[%c0_8, %c0_9, %c0_10] : memref<1x16x256xf32, #tpu.memory_space<vmem>>, vector<1x16x256xf32>
    %8 = vector.shape_cast %7 : vector<1x16x256xf32> to vector<16x256xf32>
    %cst_11 = arith.constant dense<0.000000e+00> : vector<16xf32>
    %9 = vector.multi_reduction <add>, %8, %cst_11 [1] : vector<16x256xf32> to vector<16xf32>
    %10 = vector.shape_cast %9 : vector<16xf32> to vector<16x1xf32>
    %11 = arith.addf %6, %10 : vector<16x1xf32>
    %cst_12 = arith.constant 3.906250e-03 : f32
    %12 = vector.broadcast %cst_12 : f32 to vector<16x1xf32>
    %13 = arith.mulf %11, %12 : vector<16x1xf32>
    %cst_13 = arith.constant dense<0.000000e+00> : vector<4x1xf32>
    %14 = tpu.matmul %0, %13, %cst_13 {dimension_numbers = #tpu.dot_dimension_numbers<[1], [0], [0], [1], [0, 0, 1, 1], [], []>} : vector<4x16xf32>, vector<16x1xf32>, vector<4x1xf32> -> vector<4x1xf32>
    %15 = arith.addf %14, %1 : vector<4x1xf32>
    %cst_14 = arith.constant 0.000000e+00 : f32
    %16 = vector.broadcast %cst_14 : f32 to vector<4x1xf32>
    %17 = arith.maximumf %15, %16 : vector<4x1xf32>
    %cst_15 = arith.constant dense<0.000000e+00> : vector<16x1xf32>
    %18 = tpu.matmul %2, %17, %cst_15 {dimension_numbers = #tpu.dot_dimension_numbers<[1], [0], [0], [1], [0, 0, 1, 1], [], []>} : vector<16x4xf32>, vector<4x1xf32>, vector<16x1xf32> -> vector<16x1xf32>
    %19 = math.absf %18 : vector<16x1xf32>
    %cst_16 = arith.constant 0.000000e+00 : f32
    %20 = vector.broadcast %cst_16 : f32 to vector<16x1xf32>
    %21 = arith.subf %20, %19 : vector<16x1xf32>
    %22 = math.exp %21 : vector<16x1xf32>
    %cst_17 = arith.constant 0.000000e+00 : f32
    %23 = vector.broadcast %cst_17 : f32 to vector<16x1xf32>
    %24 = arith.cmpf oge, %18, %23 : vector<16x1xf32>
    %cst_18 = arith.constant 1.000000e+00 : f32
    %25 = vector.broadcast %cst_18 : f32 to vector<16x1xf32>
    %26 = arith.addf %25, %22 : vector<16x1xf32>
    %cst_19 = arith.constant 1.000000e+00 : f32
    %27 = vector.broadcast %cst_19 : f32 to vector<16x1xf32>
    %28 = arith.divf %27, %26 : vector<16x1xf32>
    %cst_20 = arith.constant 1.000000e+00 : f32
    %29 = vector.broadcast %cst_20 : f32 to vector<16x1xf32>
    %30 = arith.addf %29, %22 : vector<16x1xf32>
    %31 = arith.divf %22, %30 : vector<16x1xf32>
    %32 = arith.select %24, %28, %31 : vector<16x1xi1>, vector<16x1xf32>
    %c0_21 = arith.constant 0 : index
    %c0_22 = arith.constant 0 : index
    %c0_23 = arith.constant 0 : index
    %33 = vector.load %arg1[%c0_21, %c0_22, %c0_23] : memref<1x16x256xf32, #tpu.memory_space<vmem>>, vector<1x16x256xf32>
    %34 = vector.shape_cast %33 : vector<1x16x256xf32> to vector<16x256xf32>
    %c0_24 = arith.constant 0 : index
    %c0_25 = arith.constant 0 : index
    %c0_26 = arith.constant 0 : index
    %35 = vector.load %arg2[%c0_24, %c0_25, %c0_26] : memref<1x16x256xf32, #tpu.memory_space<vmem>>, vector<1x16x256xf32>
    %36 = vector.shape_cast %35 : vector<1x16x256xf32> to vector<16x256xf32>
    %37 = vector.broadcast %32 : vector<16x1xf32> to vector<16x256xf32>
    %38 = arith.mulf %37, %34 : vector<16x256xf32>
    %c0_27 = arith.constant 0 : index
    %c0_28 = arith.constant 0 : index
    %c0_29 = arith.constant 0 : index
    %39 = vector.load %arg6[%c0_27, %c0_28, %c0_29] : memref<1x16x256xf32, #tpu.memory_space<vmem>>, vector<1x16x256xf32>
    %40 = vector.shape_cast %39 : vector<1x16x256xf32> to vector<16x256xf32>
    %41 = vector.shape_cast %38 : vector<16x256xf32> to vector<1x16x256xf32>
    tpu.vector_store %arg6[%c0_27, %c0_28, %c0_29], %41 {strides = array<i32>} : memref<1x16x256xf32, #tpu.memory_space<vmem>>, vector<1x16x256xf32>,
    %cst_30 = arith.constant 1.000000e+00 : f32
    %42 = vector.broadcast %cst_30 : f32 to vector<16x1xf32>
    %43 = arith.subf %42, %32 : vector<16x1xf32>
    %44 = vector.broadcast %43 : vector<16x1xf32> to vector<16x256xf32>
    %45 = arith.mulf %44, %36 : vector<16x256xf32>
    %c0_31 = arith.constant 0 : index
    %c0_32 = arith.constant 0 : index
    %c0_33 = arith.constant 0 : index
    %46 = vector.load %arg7[%c0_31, %c0_32, %c0_33] : memref<1x16x256xf32, #tpu.memory_space<vmem>>, vector<1x16x256xf32>
    %47 = vector.shape_cast %46 : vector<1x16x256xf32> to vector<16x256xf32>
    %48 = vector.shape_cast %45 : vector<16x256xf32> to vector<1x16x256xf32>
    tpu.vector_store %arg7[%c0_31, %c0_32, %c0_33], %48 {strides = array<i32>} : memref<1x16x256xf32, #tpu.memory_space<vmem>>, vector<1x16x256xf32>,
    return
  }
  func.func @transform_0(%arg0: i32) -> (i32, i32, i32) {
    %c0_i32 = arith.constant 0 : i32
    %c0_i32_0 = arith.constant 0 : i32
    %c0_i32_1 = arith.constant 0 : i32
    return %arg0, %c0_i32, %c0_i32_0 : i32, i32, i32
  }
  func.func @transform_1(%arg0: i32) -> (i32, i32, i32) {
    %c0_i32 = arith.constant 0 : i32
    %c0_i32_0 = arith.constant 0 : i32
    %c0_i32_1 = arith.constant 0 : i32
    return %arg0, %c0_i32, %c0_i32_0 : i32, i32, i32
  }
  func.func @transform_2(%arg0: i32) -> (i32, i32) {
    %c0_i32 = arith.constant 0 : i32
    %c0_i32_0 = arith.constant 0 : i32
    %c0_i32_1 = arith.constant 0 : i32
    return %c0_i32, %c0_i32_0 : i32, i32
  }
  func.func @transform_3(%arg0: i32) -> (i32, i32) {
    %c0_i32 = arith.constant 0 : i32
    %c0_i32_0 = arith.constant 0 : i32
    %c0_i32_1 = arith.constant 0 : i32
    return %c0_i32, %c0_i32_0 : i32, i32
  }
  func.func @transform_4(%arg0: i32) -> (i32, i32) {
    %c0_i32 = arith.constant 0 : i32
    %c0_i32_0 = arith.constant 0 : i32
    %c0_i32_1 = arith.constant 0 : i32
    return %c0_i32, %c0_i32_0 : i32, i32
  }
  func.func @transform_5(%arg0: i32) -> (i32, i32, i32) {
    %c0_i32 = arith.constant 0 : i32
    %c0_i32_0 = arith.constant 0 : i32
    %c0_i32_1 = arith.constant 0 : i32
    return %arg0, %c0_i32, %c0_i32_0 : i32, i32, i32
  }
  func.func @transform_6(%arg0: i32) -> (i32, i32, i32) {
    %c0_i32 = arith.constant 0 : i32
    %c0_i32_0 = arith.constant 0 : i32
    %c0_i32_1 = arith.constant 0 : i32
    return %arg0, %c0_i32, %c0_i32_0 : i32, i32, i32
  }
}

</mosaic_0001>

<bundles_post_ra>
// kernel: tpu_custom_call.1
= control target key start
LH: loop header
LB: loop body
LE: loop exit
PB: predicated region body
PF: predicated region fallthrough
CT: control target
= control target key end

     0   :  { %s1390_s0 = inlined_call_operand.hbm [shape: f32[2,16,256], index: 0, kind: input, shape index: {}]   ;;  %s1391_s1 = inlined_call_operand.hbm [shape: f32[2,16,256], index: 1, kind: input, shape index: {}]   ;;  %s1392_s2 = inlined_call_operand.vmem [shape: f32[4,16], index: 2, kind: input, shape index: {}]   ;;  %s1393_s3 = inlined_call_operand.vmem [shape: f32[4,1], index: 3, kind: input, shape index: {}]   ;;  %s1394_s4 = inlined_call_operand.vmem [shape: f32[16,4], index: 4, kind: input, shape index: {}]   ;;  %s1395_s5 = inlined_call_operand.hbm [shape: f32[2,16,256], index: 5, kind: output, shape index: {0}]   ;;  %s1396_s6 = inlined_call_operand.hbm [shape: f32[2,16,256], index: 6, kind: output, shape index: {1}]  }
   0x1   :  { %1400 = sst [smem:[#allocation14_spill]] %s1390_s0 }
   0x2   :  { %12 = vsyncpa [#allocation3], 0 }
   0x3   :  { %14 = vsyncpa [#allocation3 + $0x1], 0 }
   0x4   :  { %15 = vsyncpa [#allocation6], 0 }
   0x5   :  { %17 = vsyncpa [#allocation6 + $0x1], 0 }
   0x6   :  { %18 = vsyncpa [#allocation4], 0 }
   0x7   :  { %20 = vsyncpa [#allocation4 + $0x1], 0 }
   0x8   :  { %21 = vsyncpa [#allocation9], 0 }
   0x9   :  { %23 = vsyncpa [#allocation9 + $0x1], 0  ;;  %s1067_s21 = smov 0   ;;  %s1069_s22 = smov 0  }
   0xa   :  { %s1071_s23 = smov 0   ;;  %s1073_s24 = smov 0  }
   0xb LB: > { %s1088_s25 = sadd.s32 4294967295, %s1018_s24   ;;  %s731_s26 = sadd.s32 4294967294, %s1018_s24   ;;  %s1018_s24 = sphi %s1073_s24, %s1416_s24   ;;  %s1014_s23 = sphi %s1071_s23, %s1415_s23   ;;  %s1010_s22 = sphi %s1069_s22, %s1414_s22   ;;  %s1006_s21 = sphi %s1067_s21, %s1413_s21  }
   0xc   : > { %s1092_s27 = sadd.s32 1, %s1018_s24   ;;  %s36_s28 = sadd.s32 1, %s1014_s23 }
   0xd   : > { %s33_s29 = ssub.s32 %s1018_s24, %s1092_s27  ;;  %p43_p0 = scmp.ne.s32.totalorder %s1014_s23, %s1010_s22 }
   0xe   : > { %p34_p1 = scmp.eq.s32.totalorder %s33_s29, 0  ;;  %p44_p2 = scmp.eq.s32.totalorder %s1018_s24, 0 }
   0xf   : > { %p49_p3 = scmp.ne.s32.totalorder %s1010_s22, %s1006_s21  ;;  %p50_p4 = scmp.eq.s32.totalorder %s1088_s25, 0 }
  0x10   : > { %s1104_s30 = scalar_select %p34_p1, %s1014_s23, %s36_s28  }
  0x11   : > { %p1106_p5 = por %p44_p2, %p43_p0  ;;  %p1110_p6 = por %p50_p4, %p49_p3 }
  0x12   : > { %p162_p7 = scmp.eq.s32.totalorder %s1088_s25, 1  ;;  %p168_p8 = scmp.eq.s32.totalorder %s731_s26, 1 }
  0x13   : > { %s1402_s8 = scalar_select %p1110_p6, 1, 0 }
  0x14   : > { %p804_p10 = scmp.lt.s32.totalorder %s1018_s24, 2  ;;  %p1117_p11 = por %p162_p7, %p43_p0 }
  0x15   : > { %p1121_p12 = por %p168_p8, %p49_p3  ;;  %s1126_s11 = sand.u32 1, %s1014_s23  }
  0x16   : > { %s1403_s9 = scalar_select %p1117_p11, 1, 0 }
  0x17   : > { %s1404_s10 = scalar_select %p1121_p12, 1, 0 }
  0x18   : > { %s757_s12 = sshll.u32 %s1018_s24, 9  ;;  %s734_s13 = sshll.u32 %s1126_s11, 5 }
  0x19   : > { %s1405_s0 = sld [smem:[#allocation14_spill]]  ;;  %s227_s17 = scalar_lea.vmem [#allocation2], %s734_s13 }
  0x1a   : > { %s234_s18 = sshll.u32 %s227_s17, 4  ;;  %p1141_p13 = pnand %p804_p10, %p1106_p5  ;;  %s1145_s18 = int_to_ptr.vmem [resolvable:$true] %s234_s18 }
  0x1b   : > { %s224_s20 = scalar_lea.sflag [#allocation3], %s1126_s11 }
  0x1c   : > { %p858_p1 = pneg %p1141_p13 }
  0x1f   : > { %s1135_s16 = scalar_lea.hbm %s1405_s0, %s757_s12  ;;  %s861_s7 = scalar_lea.hbm %s1405_s0, 1024 }
  0x20   : > { %s856_s26 = scalar_lea.hbm %s1135_s16, 512  ;;  %p862_p4 = scmp.lt.u32.totalorder %s1135_s16, %s1405_s0 }
  0x21   : > { %p857_p0 = scmp.ne.s32.totalorder %s1135_s16, %s856_s26  ;;  %p863_p5 = scmp.lt.u32.totalorder %s861_s7, %s856_s26 }
  0x22   : > { %p865_p8 = scmp.lt.u32.totalorder %s856_s26, %s1135_s16 }
  0x23   : > { %p859_p2 = pnand %p858_p1, %p857_p0  ;;  %p864_p7 = por %p863_p5, %p862_p4 }
  0x25   : > { %p860_p3 = pneg %p859_p2  ;;  %p866_p10 = por %p865_p8, %p864_p7 }
  0x27   : > { %p867_p9 = pnand %p866_p10, %p860_p3 }
  0x29   : > { %870 = shalt.err (!%p867_p9)
}
  0x2a   : > { %s871_s17 = scalar_lea.vmem %s1145_s18, 512  ;;  %s1020_s28 = smov [#allocation2]  }
  0x2b   : > { %p872_p0 = scmp.ne.s32.totalorder %s1145_s18, %s871_s17  ;;  %s876_s29 = sshll.u32 %s1020_s28, 4  ;;  %s877_s29 = int_to_ptr.vmem [resolvable:$false] %s876_s29 }
  0x2c   : > { %s878_s14 = scalar_lea.vmem %s877_s29, 1024  ;;  %p879_p11 = scmp.lt.s32.totalorder %s1145_s18, %s877_s29 }
  0x2d   : > { %p874_p2 = pnand %p872_p0, %p858_p1  ;;  %p880_p4 = scmp.lt.s32.totalorder %s878_s14, %s871_s17 }
  0x2f   : > { %p875_p12 = pneg %p874_p2  ;;  %p881_p5 = por %p880_p4, %p879_p11 }
  0x31   : > { %p882_p7 = pnand %p881_p5, %p875_p12 }
  0x33   : > { %885 = shalt.err (!%p882_p7)
}
  0x34   : > { %s1398_s26 = smov 256   ;;  %s1022_s7 = smov 16  }
  0x35   : > { %793 = dma.hbm_to_vmem [thread:$0]  (!%p1141_p13), %s1135_s16, 512, %s1145_s18, %s224_s20, %s1398_s26, %s1398_s26, %s1022_s7  }
  0x36   : > { %p740_p9 = scmp.ge.s32.totalorder %s1018_s24, 1  ;;  %p263_p11 = scmp.lt.s32.totalorder %s1018_s24, 3 }
  0x37   : > { %s1189_s29 = scalar_lea.hbm %s1391_s1, %s757_s12  ;;  %s248_s14 = scalar_lea.vmem [#allocation5], %s734_s13 }
  0x38   : > { %p1180_p12 = pnand %p740_p9, %p263_p11  ;;  %s255_s0 = sshll.u32 %s248_s14, 4  ;;  %s1193_s0 = int_to_ptr.vmem [resolvable:$true] %s255_s0 }
  0x39   : > { %s245_s16 = scalar_lea.sflag [#allocation6], %s1126_s11  ;;  %s886_s18 = scalar_lea.hbm %s1189_s29, 512 }
  0x3a   : > { %p887_p3 = scmp.ne.s32.totalorder %s1189_s29, %s886_s18  ;;  %s891_s12 = scalar_lea.hbm %s1391_s1, 1024 }
  0x3b   : > { %p892_p0 = scmp.lt.u32.totalorder %s1189_s29, %s1391_s1  ;;  %p893_p2 = scmp.lt.u32.totalorder %s891_s12, %s886_s18 }
  0x3c   : > { %p889_p8 = pnand %p887_p3, %p858_p1  ;;  %p895_p5 = scmp.lt.u32.totalorder %s886_s18, %s1189_s29 }
  0x3d   : > { %p894_p4 = por %p893_p2, %p892_p0 }
  0x3e   : > { %p890_p10 = pneg %p889_p8 }
  0x3f   : > { %p896_p7 = por %p895_p5, %p894_p4 }
  0x41   : > { %p897_p9 = pnand %p896_p7, %p890_p10 }
  0x43   : > { %900 = shalt.err (!%p897_p9)
}
  0x44   : > { %s901_s13 = scalar_lea.vmem %s1193_s0, 512  ;;  %s1023_s14 = smov [#allocation5]  }
  0x45   : > { %p902_p11 = scmp.ne.s32.totalorder %s1193_s0, %s901_s13  ;;  %s906_s20 = sshll.u32 %s1023_s14, 4  ;;  %s907_s20 = int_to_ptr.vmem [resolvable:$false] %s906_s20 }
  0x46   : > { %s908_s26 = scalar_lea.vmem %s907_s20, 1024  ;;  %p909_p6 = scmp.lt.s32.totalorder %s1193_s0, %s907_s20 }
  0x47   : > { %p904_p3 = pnand %p902_p11, %p858_p1  ;;  %p910_p0 = scmp.lt.s32.totalorder %s908_s26, %s901_s13 }
  0x49   : > { %p905_p8 = pneg %p904_p3  ;;  %p911_p2 = por %p910_p0, %p909_p6 }
  0x4b   : > { %p912_p4 = pnand %p911_p2, %p905_p8 }
  0x4d   : > { %915 = shalt.err (!%p912_p4)
}
  0x4e   : > { %s1408_s18 = smov 256   ;;  %267 = sbr.rel (%p1180_p12) target bundleno = 880 (0x370), region = 40 }
  0x4f   : > { %796 = dma.hbm_to_vmem [thread:$0]  (!%p1141_p13), %s1189_s29, 512, %s1193_s0, %s245_s16, %s1408_s18, %s1408_s18, %s1022_s7  }
  0x50   : > { %s1227_s17 = sand.u32 (!%p1180_p12), 1, %s1010_s22   ;;  %p1409_p6 = scmp.ne.s32.totalorder (!%p1180_p12), %s1402_s8, 0 }
  0x51   : > { %s1230_s12 = sshll.u32 (!%p1180_p12), %s1227_s17, 5  ;;  %s270_s19 = scalar_lea.sflag (!%p1180_p12), [#allocation3], %s1227_s17 }
  0x52   : > { %s273_s28 = scalar_lea.vmem (!%p1180_p12), [#allocation2], %s1230_s12 }
  0x55   : > { %989 = dma.done.wait (%p1409_p6), %s270_s19, 512  }
  0x56   : > { %991 = vsyncadd (%p1409_p6), %s270_s19, 4294966784  ;;  %s279_s0 = scalar_lea.sflag [#allocation6], %s1227_s17  ;;  %s282_s11 = scalar_lea.vmem [#allocation5], %s1230_s12 }
  0x57   : > { %993 = dma.done.wait (%p1409_p6), %s279_s0, 512  }
  0x58   : > { %995 = vsyncadd (%p1409_p6), %s279_s0, 4294966784  ;;  %v1244_v0 = vld [vmem:[%s282_s11] sm:$0xff]  ;;  %v1246_v1 = vld [vmem:[%s282_s11 + $0x8] sm:$0xff]  ;;  %v1024_v12 = vmov 0.0|0.0   ;;  %vm1025_vm0 = vmmov 0   ;;  %v1026_v13 = vmov 0.0  }
  0x59   : > { %v1248_v2 = vld [vmem:[%s273_s28] sm:$0xff]  ;;  %v339_v3 = vadd.f32 %v1246_v1, %v1244_v0  ;;  %v1252_v4 = vld [vmem:[%s273_s28 + $0x8] sm:$0xff]  ;;  %v1254_v5 = vld [vmem:[%s282_s11 + $0x10] sm:$0xff]  ;;  %779 = vmatprep.subr.bf16.mxu0 %v1024_v12  ;;  %771 = vmatprep.mubr.msk.f32.mxu0 %vm1025_vm0, %v1026_v13  ;;  %vm349_vm1 = vcmask 130048   ;;  %vm424_vm2 = vcmask 31744   ;;  %vm431_vm3 = vcmask 1043456  }
  0x5a   : > { %v1256_v6 = vld [vmem:[%s282_s11 + $0x18] sm:$0xff]  ;;  %v329_v7 = vadd.f32 %v1252_v4, %v1248_v2  ;;  %v1260_v8 = vld [vmem:[%s273_s28 + $0x10] sm:$0xff]  ;;  %v321_v23 = vld [vmem:[%s1392_s2] sm:$0xf]  ;;  %v1027_v31 = vmov 0   ;;  %s313_s26 = scalar_lea.vmem [#allocation7], %s1230_s12 }
  0x5b   : > { %v1262_v9 = vld [vmem:[%s273_s28 + $0x18] sm:$0xff]  ;;  %340 = vadd.xlane.f32.xlu1 %v339_v3  ;;  %v342_v10 = vadd.f32 %v1256_v6, %v1254_v5  ;;  %v323_v24 = vld [vmem:[%s1394_s4] sm:$0xff]  ;;  %v324_v30 = vld [vmem:[%s1394_s4 + $0x8] sm:$0xff]  ;;  %846 = vset.pattern.permute.xlu0 %v1027_v31  ;;  %s587_s18 = sshll.u32 %s313_s26, 4  ;;  %s759_s19 = sshll.u32 %s1088_s25, 9  ;;  %s1282_s18 = int_to_ptr.vmem [resolvable:$true] %s587_s18 }
  0x5c   : > { %330 = vadd.xlane.f32.xlu0 %v329_v7  ;;  %v332_v11 = vadd.f32 %v1262_v9, %v1260_v8  ;;  %776 = vmatprep.mubr.msk.f32.mxu1 %vm424_vm2, %v323_v24  ;;  %v322_v25 = vld [vmem:[%s1393_s3] sm:$0xf]  ;;  %s1291_s11 = scalar_lea.hbm %s1395_s5, %s759_s19  ;;  %s1296_s8 = scalar_lea.vmem [#allocation8], %s1230_s12 }
  0x5d   : > { %847 = vset.pattern.permute.xlu1 %v1027_v31  ;;  %s603_s7 = sshll.u32 %s1296_s8, 4  ;;  %s569_s15 = scalar_lea.sflag [#allocation4], %s1227_s17  ;;  %s1332_s7 = int_to_ptr.vmem [resolvable:$true] %s603_s7 }
  0x5e   : > { %s916_s29 = scalar_lea.vmem %s1282_s18, 512  ;;  %p1410_p1 = scmp.ne.s32.totalorder %s1403_s9, 0 }
  0x5f   : > { %343 = vadd.xlane.f32.xlu1 %v342_v10  ;;  %p917_p13 = scmp.ne.s32.totalorder %s1282_s18, %s916_s29  ;;  %s1028_s16 = smov [#allocation7]  }
  0x60   : > { %333 = vadd.xlane.f32.xlu0 %v332_v11  ;;  %s920_s13 = sshll.u32 %s1028_s16, 4  ;;  %s921_s13 = int_to_ptr.vmem [resolvable:$false] %s920_s13 }
  0x61   : > { %p918_p12 = pnand %p917_p13, %p1410_p1  ;;  %s922_s14 = scalar_lea.vmem %s921_s13, 1024 }
  0x62   : > { %p923_p5 = scmp.lt.s32.totalorder %s1282_s18, %s921_s13  ;;  %p924_p7 = scmp.lt.s32.totalorder %s922_s14, %s916_s29 }
  0x63   : > { %p919_p10 = pneg %p918_p12 }
  0x64   : > { %p925_p9 = por %p924_p7, %p923_p5 }
  0x66   : > { %p926_p11 = pnand %p925_p9, %p919_p10 }
  0xe8   : > { %v341_v14 = vpop.xlane.xlu1 %340 }
  0xe9   : > { %v331_v15 = vpop.xlane.xlu0 %330 }
  0xea   : > { %v345_v16 = vadd.f32 %v341_v14, %v331_v15 }
  0xec   : > { %v344_v17 = vpop.xlane.xlu1 %343  ;;  %v347_v20 = vmul.f32 0.00390625, %v345_v16 }
  0xed   : > { %v334_v18 = vpop.xlane.xlu0 %333 }
  0xee   : > { %v346_v19 = vadd.f32 %v344_v17, %v334_v18 }
  0xf0   : > { %v348_v21 = vmul.f32 0.00390625, %v346_v19 }
  0xf2   : > { %v780_v22 = vpack.c.bf16 %v348_v21, %v347_v20 }
  0xf4   : > { %781 = vmatpush3.bf16.msra.mxu0 %v780_v22 }
  0xf7   : > { %772 = vmatmul.mubr.msk.f32.vlgmr.msra.gmra.mrb[0].mxu0 %vm349_vm1, %v321_v23 }
 0x1ca   : > { %v419_v26 = vpop.f32.mrb[0].mxu0 }
 0x1cb   : > { %v420_v27 = vadd.f32 %v419_v26, %v322_v25  ;;  %v773_v28 = vpop.f32.mrb[1].mxu0 }
 0x1cd   : > { %v423_v29 = vmax.f32 %v420_v27, 0.0 }
 0x1cf   : > { %774 = vmatprep.subr.msk.mxu1 %vm431_vm3, %v423_v29 }
 0x1d0   : > { %775 = vmatpush3.msk.msra.mxu1 %vm431_vm3, %v423_v29 }
 0x1d1   : > { %777 = vmatmul.mubr.msk.f32.vlgmr.msra.gmra.mrb[0].mxu1 %vm424_vm2, %v324_v30 }
 0x2a4   : > { %v778_v32 = vpop.f32.mrb[0].mxu1 }
 0x2a5   : > { %v511_v33 = vand.u32 2147483647, %v778_v32  ;;  %v501_v34 = vpop.f32.mrb[1].mxu1  ;;  %vm519_vm4 = vcmp.ge.f32.partialorder %v778_v32, 0.0 }
 0x2a6   : > { %v510_v35 = vand.u32 2147483647, %v501_v34  ;;  %vm518_vm5 = vcmp.ge.f32.partialorder %v501_v34, 0.0 }
 0x2a7   : > { %v513_v36 = vsub.f32 0.0, %v511_v33 }
 0x2a8   : > { %v512_v37 = vsub.f32 0.0, %v510_v35 }
 0x2a9   : > { %v516_v38 = vmul.f32 1.442695, %v513_v36 }
 0x2aa   : > { %v514_v39 = vmul.f32 1.442695, %v512_v37 }
 0x2ab   : > { %848 = vpow2.f32 %v516_v38 }
 0x2ac   : > { %850 = vpow2.f32 %v514_v39 }
 0x2b5   : > { %v849_v40 = vpop.eup %848 }
 0x2b6   : > { %v851_v41 = vpop.eup %850  ;;  %v521_v42 = vadd.f32 1.0, %v849_v40 }
 0x2b7   : > { %v520_v43 = vadd.f32 1.0, %v851_v41 }
 0x2b8   : > { %852 = vrcp.f32 %v521_v42 }
 0x2b9   : > { %854 = vrcp.f32 %v520_v43 }
 0x2c2   : > { %v853_v44 = vpop.eup %852 }
 0x2c3   : > { %v855_v45 = vpop.eup %854  ;;  %v527_v46 = vmul.f32 %v853_v44, %v849_v40 }
 0x2c4   : > { %v526_v47 = vmul.f32 %v855_v45, %v851_v41 }
 0x2c5   : > { %v529_v48 = vsel %vm519_vm4, %v853_v44, %v527_v46 }
 0x2c6   : > { %537 = vperm.xlu1 %847, %v529_v48   ;;  %v528_v49 = vsel %vm518_vm5, %v855_v45, %v526_v47  ;;  %v549_v51 = vsub.f32 1.0, %v529_v48 }
 0x2c7   : > { %532 = vperm.xlu0 %846, %v528_v49   ;;  %v548_v50 = vsub.f32 1.0, %v528_v49 }
 0x2ca   : > { %552 = vperm.xlu1 %847, %v548_v50  }
 0x2ce   : > { %557 = vperm.xlu1 %847, %v549_v51  }
 0x345   : > { %v538_v52 = vpop.permute.xlu1 %537 }
 0x346   : > { %v542_v53 = vmul.f32 %v538_v52, %v1260_v8  ;;  %v543_v54 = vmul.f32 %v538_v52, %v1262_v9  ;;  %v533_v55 = vpop.permute.xlu0 %532 }
 0x347   : > { %v540_v56 = vmul.f32 %v533_v55, %v1248_v2  ;;  %v541_v57 = vmul.f32 %v533_v55, %v1252_v4 }
 0x348   : > { %546 = vst [vmem:[%s313_s26 + $0x10] sm:$0xff] %v542_v53  ;;  %547 = vst [vmem:[%s313_s26 + $0x18] sm:$0xff] %v543_v54 }
 0x349   : > { %544 = vst [vmem:[%s313_s26] sm:$0xff] %v540_v56  ;;  %545 = vst [vmem:[%s313_s26 + $0x8] sm:$0xff] %v541_v57  ;;  %v553_v58 = vpop.permute.xlu1 %552 }
 0x34a   : > { %v560_v59 = vmul.f32 %v553_v58, %v1244_v0  ;;  %v561_v60 = vmul.f32 %v553_v58, %v1246_v1 }
 0x34b   : > { %929 = shalt.err (!%p926_p11)
}
 0x34c   : > { %s930_s12 = scalar_lea.hbm %s1291_s11, 512  ;;  %s934_s28 = scalar_lea.hbm %s1395_s5, 1024 }
 0x34d   : > { %p931_p3 = scmp.ne.s32.totalorder %s1291_s11, %s930_s12  ;;  %p935_p2 = scmp.lt.u32.totalorder %s1291_s11, %s1395_s5 }
 0x34e   : > { %p936_p4 = scmp.lt.u32.totalorder %s934_s28, %s930_s12  ;;  %p938_p13 = scmp.lt.u32.totalorder %s930_s12, %s1291_s11 }
 0x34f   : > { %p932_p8 = pnand %p931_p3, %p1410_p1 }
 0x350   : > { %p937_p6 = por %p936_p4, %p935_p2 }
 0x351   : > { %p933_p0 = pneg %p932_p8 }
 0x352   : > { %p939_p12 = por %p938_p13, %p937_p6 }
 0x354   : > { %p940_p10 = pnand %p939_p12, %p933_p0 }
 0x356   : > { %943 = shalt.err (!%p940_p10)
}
 0x357   : > { %s1029_s29 = smov 256   ;;  %s1030_s13 = smov 16   ;;  %564 = vst [vmem:[%s1296_s8] sm:$0xff] %v560_v59  ;;  %565 = vst [vmem:[%s1296_s8 + $0x8] sm:$0xff] %v561_v60  ;;  %v558_v61 = vpop.permute.xlu1 %557 }
 0x358   : > { %786 = dma.vmem_to_hbm [thread:$0]  (%p1410_p1), %s1282_s18, 512, %s1291_s11, %s569_s15, %s1029_s29, %s1029_s29, %s1030_s13   ;;  %v562_v62 = vmul.f32 %v558_v61, %v1254_v5  ;;  %v563_v63 = vmul.f32 %v558_v61, %v1256_v6 }
 0x359   : > { %s1341_s20 = scalar_lea.hbm %s1396_s6, %s759_s19  ;;  %s574_s18 = scalar_lea.sflag [#allocation9], %s1227_s17 }
 0x35a   : > { %566 = vst [vmem:[%s1296_s8 + $0x10] sm:$0xff] %v562_v62  ;;  %567 = vst [vmem:[%s1296_s8 + $0x18] sm:$0xff] %v563_v63  ;;  %s944_s11 = scalar_lea.vmem %s1332_s7, 512  ;;  %s1031_s15 = smov [#allocation8]  }
 0x35b   : > { %p945_p5 = scmp.ne.s32.totalorder %s1332_s7, %s944_s11  ;;  %s948_s26 = sshll.u32 %s1031_s15, 4  ;;  %s949_s26 = int_to_ptr.vmem [resolvable:$false] %s948_s26 }
 0x35c   : > { %s950_s28 = scalar_lea.vmem %s949_s26, 1024  ;;  %p951_p11 = scmp.lt.s32.totalorder %s1332_s7, %s949_s26 }
 0x35d   : > { %p946_p7 = pnand %p945_p5, %p1410_p1  ;;  %p952_p3 = scmp.lt.s32.totalorder %s950_s28, %s944_s11 }
 0x35f   : > { %p947_p9 = pneg %p946_p7  ;;  %p953_p8 = por %p952_p3, %p951_p11 }
 0x361   : > { %p954_p0 = pnand %p953_p8, %p947_p9 }
 0x363   : > { %957 = shalt.err (!%p954_p0)
}
 0x364   : > { %s958_s25 = scalar_lea.hbm %s1341_s20, 512  ;;  %s962_s0 = scalar_lea.hbm %s1396_s6, 1024 }
 0x365   : > { %p959_p2 = scmp.ne.s32.totalorder %s1341_s20, %s958_s25  ;;  %p963_p13 = scmp.lt.u32.totalorder %s1341_s20, %s1396_s6 }
 0x366   : > { %p964_p12 = scmp.lt.u32.totalorder %s962_s0, %s958_s25  ;;  %p966_p5 = scmp.lt.u32.totalorder %s958_s25, %s1341_s20 }
 0x367   : > { %p960_p4 = pnand %p959_p2, %p1410_p1 }
 0x368   : > { %p965_p10 = por %p964_p12, %p963_p13 }
 0x369   : > { %p961_p6 = pneg %p960_p4 }
 0x36a   : > { %p967_p7 = por %p966_p5, %p965_p10 }
 0x36c   : > { %p968_p9 = pnand %p967_p7, %p961_p6 }
 0x36e   : > { %971 = shalt.err (!%p968_p9)
}
 0x36f   : > { %787 = dma.vmem_to_hbm [thread:$0]  (%p1410_p1), %s1332_s7, 512, %s1341_s20, %s574_s18, %s1029_s29, %s1029_s29, %s1030_s13  }
 0x370 PF: > { %s618_s12 = sand.u32 1, %s1006_s21   ;;  %p1411_p11 = scmp.ne.s32.totalorder %s1404_s10, 0 }
 0x371   : > { %p1412_p3 = scmp.ge.s32.totalorder %s1018_s24, 2  ;;  %s619_s11 = scalar_lea.sflag [#allocation4], %s618_s12 }
 0x373   : > { %p798_p8 = pnand %p1412_p3, %p1411_p11 }
 0x375   : > { %997 = dma.done.wait (!%p798_p8), %s619_s11, 512  }
 0x376   : > { %999 = vsyncadd (!%p798_p8), %s619_s11, 4294966784  ;;  %s628_s9 = scalar_lea.sflag [#allocation9], %s618_s12 }
 0x377   : > { %1001 = dma.done.wait (!%p798_p8), %s628_s9, 512  }
 0x378   : > { %1003 = vsyncadd (!%p798_p8), %s628_s9, 4294966784  ;;  %p26_p1 = scmp.ge.s32.totalorder %s1092_s27, 4   ;;  %s1413_s21 = smov %s1010_s22 }
 0x379   : > { %s1414_s22 = smov %s1014_s23  ;;  %s1415_s23 = smov %s1104_s30 }
 0x37a   : > { %s1416_s24 = smov %s1092_s27  ;;  %28 = sbr.rel (!%p26_p1) target bundleno = 11 (0xb), region = 115 }
 0x381   :  { %633 = vsyncpa [#allocation3], 1 }
 0x382   :  { %635 = vsyncpa [#allocation3 + $0x1], 1 }
 0x383   :  { %636 = vsyncpa [#allocation6], 1 }
 0x384   :  { %638 = vsyncpa [#allocation6 + $0x1], 1 }
 0x385   :  { %639 = vsyncpa [#allocation4], 1 }
 0x386   :  { %641 = vsyncpa [#allocation4 + $0x1], 1 }
 0x387   :  { %642 = vsyncpa [#allocation9], 1 }
 0x388   :  { %644 = vsyncpa [#allocation9 + $0x1], 1 }

</bundles_post_ra>
